<compile_context>
chip_gen: v7x
topology: tpu7x:2x2x1
jax: 0.10.0
libtpu: 0.0.40
codegen_flags: <defaults>
</compile_context>

<pallas_src>
import functools

import jax
import jax.numpy as jnp
from jax import lax
from jax.experimental import pallas as pl
from jax.experimental.pallas import tpu as pltpu

KERNEL_SIZE = 3
INHIBITION_STRENGTH = 0.15

_SURROUND_COEF = INHIBITION_STRENGTH / (KERNEL_SIZE * KERNEL_SIZE - 1)  # s/8
_CENTER_COEF = 1.0 + _SURROUND_COEF                                     # 1 + s/8


def make_li_kernel_weights(dtype=jnp.float32):
    """Deterministic 3x3 center-surround lateral inhibition kernel (reference)."""
    k = jnp.full((KERNEL_SIZE, KERNEL_SIZE), -_SURROUND_COEF, dtype=dtype)
    k = k.at[KERNEL_SIZE // 2, KERNEL_SIZE // 2].set(1.0)
    return k


def _li_stencil_kernel(x_ref, o_ref, *, w):
    """Depthwise 3x3 center-surround stencil on lane-packed image planes.

    x_ref / o_ref: (T, HP, L) where every (HP, L) slab is one (H, W) plane in
    row-major order with k = L // W consecutive image rows folded into each
    packed row (a metadata-only reshape done by the wrapper).

    All "same" zero padding is realised on values: a shift of +-1 / +-W in the
    flat row-major plane index is a lane roll plus, for the lanes that cross a
    packed-row boundary, a sublane roll; iota/where masks zero the plane
    borders. The only VMEM store is the final output tile.
    """
    _, hp, l = x_ref.shape
    xf = x_ref[...].astype(jnp.float32)  # hoisted single cast, f32 accumulation

    lane = lax.broadcasted_iota(jnp.int32, (hp, l), 1)   # packed lane index j
    prow = lax.broadcasted_iota(jnp.int32, (hp, l), 0)   # packed row index
    col = lane % w                                       # original column

    # ---- horizontal neighbours: lane rolls masked at the W boundaries -----
    if w >= 2:
        left = jnp.where(col >= 1, pltpu.roll(xf, 1, axis=2), 0.0)
        right = jnp.where(col <= w - 2, pltpu.roll(xf, l - 1, axis=2), 0.0)
        rs = xf + left + right            # 3-tap row sum, zero outside plane
    else:
        rs = xf

    # ---- vertical neighbours: +-W shift in flat row-major plane order -----
    if l == w:
        # Un-folded layout: +-1 image row == +-1 sublane row.
        if hp >= 2:
            up = jnp.where(prow >= 1, pltpu.roll(rs, 1, axis=1), 0.0)
            down = jnp.where(prow <= hp - 2, pltpu.roll(rs, hp - 1, axis=1), 0.0)
        else:
            up = jnp.zeros_like(rs)
            down = jnp.zeros_like(rs)
    else:
        # Folded layout: lane roll by W; the first/last W lanes of each packed
        # row additionally cross into the neighbouring packed row (sublane
        # roll), and the very first/last image row of the plane is zero.
        up_a = pltpu.roll(rs, w, axis=2)
        dn_a = pltpu.roll(rs, l - w, axis=2)
        if hp >= 2:
            up_b = pltpu.roll(up_a, 1, axis=1)
            dn_b = pltpu.roll(dn_a, hp - 1, axis=1)
            up = jnp.where(lane >= w, up_a,
                           jnp.where(prow >= 1, up_b, 0.0))
            down = jnp.where(lane < l - w, dn_a,
                             jnp.where(prow <= hp - 2, dn_b, 0.0))
        else:
            up = jnp.where(lane >= w, up_a, 0.0)
            down = jnp.where(lane < l - w, dn_a, 0.0)

    box = rs + up + down                  # full 3x3 box sum with zero padding
    o_ref[...] = (_CENTER_COEF * xf - _SURROUND_COEF * box).astype(o_ref.dtype)


def _round_up(v, m):
    return (v + m - 1) // m * m


def _choose_fold(h, w):
    """Pick k | H so each (H, W) plane is viewed as (H/k, k*W) lane-densely.

    The reshape is metadata-only (row-major). We minimise the (8, 128)
    layout-rounded footprint and prefer a lane dim that is an exact multiple
    of 128 (unmasked full-vreg stores: the biggest measured store-path lever).
    """
    best_key, best_k = None, 1
    for k in range(1, h + 1):
        if h % k:
            continue
        hp, lanes = h // k, k * w
        padded = _round_up(hp, 8) * _round_up(lanes, 128)
        key = (padded, 0 if lanes % 128 == 0 else 1, k)
        if best_key is None or key < best_key:
            best_key, best_k = key, k
    return best_k


def _choose_plane_tile(n_planes, plane_padded_bytes):
    """Planes per grid block, sized against the real (layout-rounded) VMEM bill."""
    # Full bill = 2x double-buffered input block + 2x output block; ~3 MiB
    # blocks keep that ~12 MiB, inside every generation's default scoped VMEM
    # (16 MiB v5e / 32 MiB v6e / 32-of-64 MiB v7x) with headroom for the f32
    # intermediates, and in the measured ~85%-of-HBM-roofline tile regime.
    block_budget = 3 * 1024 * 1024
    min_block = 512 * 1024
    t = max(1, block_budget // max(plane_padded_bytes, 1))
    t = min(t, n_planes)
    # Keep >= 8 grid steps (>= 4 per v7x TensorCore) for DMA/compute overlap,
    # unless that pushes blocks into the per-step-overhead regime; always keep
    # >= 2 steps so both v7x cores get work.
    cap = max(1, n_planes // 8)
    if cap * plane_padded_bytes < min_block:
        cap = max(1, n_planes // 2)
    t = max(1, min(t, cap))
    # Prefer an exact divisor of n_planes (no ragged tail -> no wasted tail
    # DMA/compute), as long as it does not shrink the block by more than 2x.
    for d in range(t, 0, -1):
        if n_planes % d == 0:
            if 2 * d >= t:
                t = d
            break
    return t


@jax.jit
def lateral_inhibition_forward(photoreceptor_activation):
    """NCHW depthwise center-surround lateral inhibition via Pallas."""
    x = photoreceptor_activation
    n, c, h, w = x.shape
    nc = n * c

    # Lane-pack k image rows per packed row (metadata-only row-major reshape).
    k = _choose_fold(h, w)
    hp, lanes = h // k, k * w
    x_packed = x.reshape(nc, hp, lanes)

    plane_padded_bytes = _round_up(hp, 8) * _round_up(lanes, 128) * 4
    t = _choose_plane_tile(nc, plane_padded_bytes)
    grid = (pl.cdiv(nc, t),)

    # TODO(synk): add H-banding (overlapping 1-row-halo blocks) for planes too
    # large to double-buffer whole in VMEM (e.g. >= 2048x2048 f32 on v7x 64MiB).

    nelem = nc * h * w
    cost = pl.CostEstimate(
        flops=12 * nelem,                              # stencil adds/muls/selects
        transcendentals=0,
        bytes_accessed=2 * nelem * x.dtype.itemsize,   # read x + write y
    )

    out_packed = pl.pallas_call(
        functools.partial(_li_stencil_kernel, w=w),
        out_shape=jax.ShapeDtypeStruct((nc, hp, lanes), x.dtype),
        grid_spec=pltpu.PrefetchScalarGridSpec(
            num_scalar_prefetch=0,
            grid=grid,
            in_specs=[
                # Last two block dims equal the full array dims -> always
                # satisfies the (8, 128) BlockSpec divisibility rule.
                pl.BlockSpec((t, hp, lanes), lambda i: (i, 0, 0)),
            ],
            out_specs=pl.BlockSpec((t, hp, lanes), lambda i: (i, 0, 0)),
        ),
        compiler_params=pltpu.CompilerParams(
            dimension_semantics=("parallel",)),
        cost_estimate=cost,
    )(x_packed)

    return out_packed.reshape(n, c, h, w)


class LateralInhibitionPallas:
    """Concrete lateral inhibition with the AbstractLateralInhibition API."""

    def __init__(self, params=None, device=None):
        del params, device
        self.kernel_weights = make_li_kernel_weights()  # for reference/inspection

    def forward(self, photoreceptor_activation):
        return lateral_inhibition_forward(photoreceptor_activation)

    def get_kernel_size(self):
        return KERNEL_SIZE


def _reference(x, kernel):
    """Pure-JAX reference: depthwise 3x3 conv, zero 'same' padding."""
    _, _, h, w = x.shape
    pad = KERNEL_SIZE // 2
    xp = jnp.pad(x, ((0, 0), (0, 0), (pad, pad), (pad, pad)))
    out = jnp.zeros_like(x)
    for di in range(KERNEL_SIZE):
        for dj in range(KERNEL_SIZE):
            out = out + kernel[di, dj] * xp[:, :, di:di + h, dj:dj + w]
    return out


if __name__ == "__main__":
    module = LateralInhibitionPallas()

    # Primary shape from the module spec (exercises the lane-folded path:
    # W=16 -> each packed row holds 8 image rows = 128 dense lanes).
    x = jax.random.normal(jax.random.PRNGKey(0), (2, 4, 16, 16), dtype=jnp.float32)
    y = jax.block_until_ready(module.forward(x))
    y_ref = _reference(x, module.kernel_weights)
    assert y.shape == x.shape and y.dtype == x.dtype
    assert jnp.allclose(y, y_ref, atol=1e-5, rtol=1e-5)

    # Secondary shape exercising the un-folded (W % 128 == 0) path.
    x2 = jax.random.normal(jax.random.PRNGKey(0), (1, 3, 8, 128), dtype=jnp.float32)
    y2 = jax.block_until_ready(module.forward(x2))
    y2_ref = _reference(x2, module.kernel_weights)
    assert jnp.allclose(y2, y2_ref, atol=1e-5, rtol=1e-5)

    assert module.get_kernel_size() == KERNEL_SIZE
    print("KERNEL_OK")
</pallas_src>

<mosaic_0001>
module attributes {stable_mosaic.version = 11 : i64} {
  func.func @_li_stencil_kernel(%arg0: i32, %arg1: memref<4x2x128xf32, #tpu.memory_space<vmem>>, %arg2: memref<4x2x128xf32, #tpu.memory_space<vmem>>) attributes {dimension_semantics = [#tpu.dimension_semantics<parallel>], iteration_bounds = array<i64: 2>, scalar_prefetch = 0 : i64, scratch_operands = 0 : i64, tpu.core_type = #tpu.core_type<tc>, window_params = [{transform_indices = @transform_0, window_bounds = array<i64: 4, 2, 128>}, {transform_indices = @transform_1, window_bounds = array<i64: 4, 2, 128>}]} {
    %c0 = arith.constant 0 : index
    %c0_0 = arith.constant 0 : index
    %c0_1 = arith.constant 0 : index
    %0 = vector.load %arg1[%c0, %c0_0, %c0_1] : memref<4x2x128xf32, #tpu.memory_space<vmem>>, vector<4x2x128xf32>
    %1 = tpu.iota {dimensions = array<i32: 1>} : vector<2x128xi32>
    %2 = tpu.iota {dimensions = array<i32: 0>} : vector<2x128xi32>
    %c16_i32 = arith.constant 16 : i32
    %c0_i32 = arith.constant 0 : i32
    %3 = arith.cmpi eq, %c16_i32, %c0_i32 : i32
    %c1_i32 = arith.constant 1 : i32
    %4 = arith.select %3, %c1_i32, %c16_i32 : i32
    %5 = vector.broadcast %4 : i32 to vector<2x128xi32>
    %6 = arith.remsi %1, %5 : vector<2x128xi32>
    %c0_i32_2 = arith.constant 0 : i32
    %7 = vector.broadcast %c0_i32_2 : i32 to vector<2x128xi32>
    %8 = arith.cmpi ne, %6, %7 : vector<2x128xi32>
    %c0_i32_3 = arith.constant 0 : i32
    %9 = vector.broadcast %c0_i32_3 : i32 to vector<2x128xi32>
    %10 = arith.cmpi slt, %6, %9 : vector<2x128xi32>
    %c0_i32_4 = arith.constant 0 : i32
    %11 = arith.cmpi slt, %4, %c0_i32_4 : i32
    %12 = vector.broadcast %11 : i1 to vector<2x128xi1>
    %13 = vector.broadcast %12 : vector<2x128xi1> to vector<2x128xi1>
    %14 = arith.xori %10, %13 : vector<2x128xi1>
    %15 = arith.andi %14, %8 : vector<2x128xi1>
    %16 = vector.broadcast %4 : i32 to vector<2x128xi32>
    %17 = arith.addi %6, %16 : vector<2x128xi32>
    %18 = arith.select %15, %17, %6 : vector<2x128xi1>, vector<2x128xi32>
    %c1_i32_5 = arith.constant 1 : i32
    %19 = vector.broadcast %c1_i32_5 : i32 to vector<2x128xi32>
    %20 = arith.cmpi sge, %18, %19 : vector<2x128xi32>
    %c1_i32_6 = arith.constant 1 : i32
    %21 = tpu.dynamic_rotate %0 by %c1_i32_6 dim 2 : vector<4x2x128xf32>, i32 -> vector<4x2x128xf32>
    %cst = arith.constant 0.000000e+00 : f32
    %22 = vector.shape_cast %20 : vector<2x128xi1> to vector<1x2x128xi1>
    %23 = vector.broadcast %22 : vector<1x2x128xi1> to vector<4x2x128xi1>
    %24 = vector.broadcast %cst : f32 to vector<4x2x128xf32>
    %25 = arith.select %23, %21, %24 : vector<4x2x128xi1>, vector<4x2x128xf32>
    %c14_i32 = arith.constant 14 : i32
    %26 = vector.broadcast %c14_i32 : i32 to vector<2x128xi32>
    %27 = arith.cmpi sle, %18, %26 : vector<2x128xi32>
    %c127_i32 = arith.constant 127 : i32
    %28 = tpu.dynamic_rotate %0 by %c127_i32 dim 2 : vector<4x2x128xf32>, i32 -> vector<4x2x128xf32>
    %cst_7 = arith.constant 0.000000e+00 : f32
    %29 = vector.shape_cast %27 : vector<2x128xi1> to vector<1x2x128xi1>
    %30 = vector.broadcast %29 : vector<1x2x128xi1> to vector<4x2x128xi1>
    %31 = vector.broadcast %cst_7 : f32 to vector<4x2x128xf32>
    %32 = arith.select %30, %28, %31 : vector<4x2x128xi1>, vector<4x2x128xf32>
    %33 = arith.addf %0, %25 : vector<4x2x128xf32>
    %34 = arith.addf %33, %32 : vector<4x2x128xf32>
    %c16_i32_8 = arith.constant 16 : i32
    %35 = tpu.dynamic_rotate %34 by %c16_i32_8 dim 2 : vector<4x2x128xf32>, i32 -> vector<4x2x128xf32>
    %c112_i32 = arith.constant 112 : i32
    %36 = tpu.dynamic_rotate %34 by %c112_i32 dim 2 : vector<4x2x128xf32>, i32 -> vector<4x2x128xf32>
    %c1_i32_9 = arith.constant 1 : i32
    %37 = tpu.dynamic_rotate %35 by %c1_i32_9 dim 1 : vector<4x2x128xf32>, i32 -> vector<4x2x128xf32>
    %c1_i32_10 = arith.constant 1 : i32
    %38 = tpu.dynamic_rotate %36 by %c1_i32_10 dim 1 : vector<4x2x128xf32>, i32 -> vector<4x2x128xf32>
    %c16_i32_11 = arith.constant 16 : i32
    %39 = vector.broadcast %c16_i32_11 : i32 to vector<2x128xi32>
    %40 = arith.cmpi sge, %1, %39 : vector<2x128xi32>
    %c1_i32_12 = arith.constant 1 : i32
    %41 = vector.broadcast %c1_i32_12 : i32 to vector<2x128xi32>
    %42 = arith.cmpi sge, %2, %41 : vector<2x128xi32>
    %cst_13 = arith.constant 0.000000e+00 : f32
    %43 = vector.shape_cast %42 : vector<2x128xi1> to vector<1x2x128xi1>
    %44 = vector.broadcast %43 : vector<1x2x128xi1> to vector<4x2x128xi1>
    %45 = vector.broadcast %cst_13 : f32 to vector<4x2x128xf32>
    %46 = arith.select %44, %37, %45 : vector<4x2x128xi1>, vector<4x2x128xf32>
    %47 = vector.shape_cast %40 : vector<2x128xi1> to vector<1x2x128xi1>
    %48 = vector.broadcast %47 : vector<1x2x128xi1> to vector<4x2x128xi1>
    %49 = arith.select %48, %35, %46 : vector<4x2x128xi1>, vector<4x2x128xf32>
    %c112_i32_14 = arith.constant 112 : i32
    %50 = vector.broadcast %c112_i32_14 : i32 to vector<2x128xi32>
    %51 = arith.cmpi slt, %1, %50 : vector<2x128xi32>
    %c0_i32_15 = arith.constant 0 : i32
    %52 = vector.broadcast %c0_i32_15 : i32 to vector<2x128xi32>
    %53 = arith.cmpi sle, %2, %52 : vector<2x128xi32>
    %cst_16 = arith.constant 0.000000e+00 : f32
    %54 = vector.shape_cast %53 : vector<2x128xi1> to vector<1x2x128xi1>
    %55 = vector.broadcast %54 : vector<1x2x128xi1> to vector<4x2x128xi1>
    %56 = vector.broadcast %cst_16 : f32 to vector<4x2x128xf32>
    %57 = arith.select %55, %38, %56 : vector<4x2x128xi1>, vector<4x2x128xf32>
    %58 = vector.shape_cast %51 : vector<2x128xi1> to vector<1x2x128xi1>
    %59 = vector.broadcast %58 : vector<1x2x128xi1> to vector<4x2x128xi1>
    %60 = arith.select %59, %36, %57 : vector<4x2x128xi1>, vector<4x2x128xf32>
    %61 = arith.addf %34, %49 : vector<4x2x128xf32>
    %62 = arith.addf %61, %60 : vector<4x2x128xf32>
    %cst_17 = arith.constant 1.018750e+00 : f32
    %63 = vector.broadcast %cst_17 : f32 to vector<4x2x128xf32>
    %64 = arith.mulf %63, %0 : vector<4x2x128xf32>
    %cst_18 = arith.constant 1.875000e-02 : f32
    %65 = vector.broadcast %cst_18 : f32 to vector<4x2x128xf32>
    %66 = arith.mulf %65, %62 : vector<4x2x128xf32>
    %67 = arith.subf %64, %66 : vector<4x2x128xf32>
    %c0_19 = arith.constant 0 : index
    %c0_20 = arith.constant 0 : index
    %c0_21 = arith.constant 0 : index
    %68 = vector.load %arg2[%c0_19, %c0_20, %c0_21] : memref<4x2x128xf32, #tpu.memory_space<vmem>>, vector<4x2x128xf32>
    tpu.vector_store %arg2[%c0_19, %c0_20, %c0_21], %67 {strides = array<i32>} : memref<4x2x128xf32, #tpu.memory_space<vmem>>, vector<4x2x128xf32>,
    return
  }
  func.func @transform_0(%arg0: i32) -> (i32, i32, i32) {
    %c0_i32 = arith.constant 0 : i32
    %c0_i32_0 = arith.constant 0 : i32
    %c0_i32_1 = arith.constant 0 : i32
    return %arg0, %c0_i32, %c0_i32_0 : i32, i32, i32
  }
  func.func @transform_1(%arg0: i32) -> (i32, i32, i32) {
    %c0_i32 = arith.constant 0 : i32
    %c0_i32_0 = arith.constant 0 : i32
    %c0_i32_1 = arith.constant 0 : i32
    return %arg0, %c0_i32, %c0_i32_0 : i32, i32, i32
  }
}

</mosaic_0001>

<bundles_post_ra>
// kernel: lateral_inhibition_forward.1
= control target key start
LH: loop header
LB: loop body
LE: loop exit
PB: predicated region body
PF: predicated region fallthrough
CT: control target
= control target key end

     0   :  { %s404_s6 = smov 0   ;;  %s559_s0 = inlined_call_operand.vmem [shape: f32[8,2,128], index: 0, kind: input, shape index: {}]   ;;  %s560_s1 = inlined_call_operand.vmem [shape: f32[8,2,128], index: 1, kind: output, shape index: {}]  }
   0x1 LB: > { %s359_s7 = sadd.s32 4294967295, %s388_s6   ;;  %p363_p0 = scmp.ge.s32.totalorder %s388_s6, 1  ;;  %s388_s6 = sphi %s404_s6, %s11_s6  }
   0x2   : > { %p88_p1 = scmp.lt.s32.totalorder %s388_s6, 3 }
   0x4   : > { %p89_p2 = pnand %p363_p0, %p88_p1 }
   0x5   : > { %s364_s8 = sshll.u32 (!%p89_p2), %s359_s7, 2  ;;  %s390_s13 = smov (!%p89_p2), 1   ;;  %v124_v4 = vlaneseq (!%p89_p2)  ;;  %vm194_vm2 = vcmask (!%p89_p2), 1047554  }
   0x6   : > { %92 = sbr.rel (%p89_p2) target bundleno = 288 (0x120), region = 24  ;;  %p109_p3 = scmp.lt.s32.totalorder (!%p89_p2), %s364_s8, 7 }
   0x7   : > { %s391_s14 = smov (!%p89_p2), 127   ;;  %v436_v5 = vand.u32 (!%p89_p2), 127, %v124_v4  ;;  %s392_s15 = smov (!%p89_p2), 16   ;;  %v483_v35 = vshrl.u32 (!%p89_p2), %v124_v4, 7 }
   0x8   : > { %s393_s16 = smov (!%p89_p2), 112  }
   0x9   : > { %v132_v6 = vand.u32 (!%p89_p2), 15, %v436_v5  ;;  %vm228_vm3 = vcmp.ge.s32.totalorder (!%p89_p2), %v483_v35, 1  ;;  %vm227_vm4 = vcmp.ge.s32.totalorder (!%p89_p2), %v436_v5, 16  ;;  %vm254_vm5 = vcmp.le.s32.totalorder (!%p89_p2), %v483_v35, 0 }
   0xa   : > { %vm253_vm6 = vcmp.lt.s32.totalorder (!%p89_p2), %v436_v5, 112 }
   0xb   : > { %vm439_vm0 = vcmp.ge.s32.totalorder (!%p89_p2), %v132_v6, 1  ;;  %vm445_vm1 = vcmp.le.s32.totalorder (!%p89_p2), %v132_v6, 14 }
   0xd   : > { %s566_s8 = smov (!%p109_p3, %s364_s8), 7 }
   0xe   : > { %s365_s9 = sshll.u32 %s566_s8, 1 }
   0xf   : > { %s112_s12 = scalar_lea.vmem %s559_s0, %s365_s9  ;;  %s527_s19 = scalar_lea.vmem %s560_s1, %s365_s9 }
  0x10   : > { %v420_v0 = vld [vmem:[%s112_s12 + $0x4] sm:$0x3]  ;;  %v422_v1 = vld [vmem:[%s112_s12] sm:$0x3]  ;;  %v426_v2 = vld [vmem:[%s112_s12 + $0x2] sm:$0x3] }
  0x11   : > { %145 = vrot.lane.b32.xlu1 %v420_v0, %s390_s13  ;;  %141 = vrot.lane.b32.xlu0 %v422_v1, %s390_s13  ;;  %v430_v3 = vld [vmem:[%s112_s12 + $0x6] sm:$0x3] }
  0x15   : > { %156 = vrot.lane.b32.xlu1 %v422_v1, %s391_s14  ;;  %143 = vrot.lane.b32.xlu0 %v426_v2, %s390_s13 }
  0x19   : > { %158 = vrot.lane.b32.xlu1 %v426_v2, %s391_s14  ;;  %147 = vrot.lane.b32.xlu0 %v430_v3, %s390_s13 }
  0x1d   : > { %162 = vrot.lane.b32.xlu1 %v430_v3, %s391_s14  ;;  %160 = vrot.lane.b32.xlu0 %v420_v0, %s391_s14 }
  0x83   : > { %v146_v8 = vpop.permute.xlu1 %145  ;;  %v142_v9 = vpop.permute.xlu0 %141 }
  0x84   : > { %v151_v10 = vsel %vm439_vm0, %v142_v9, 0.0  ;;  %v153_v21 = vsel %vm439_vm0, %v146_v8, 0.0 }
  0x85   : > { %v170_v12 = vadd.f32 %v151_v10, %v422_v1  ;;  %v172_v24 = vadd.f32 %v153_v21, %v420_v0 }
  0x87   : > { %v157_v13 = vpop.permute.xlu1 %156  ;;  %v144_v14 = vpop.permute.xlu0 %143 }
  0x88   : > { %v166_v15 = vsel %vm445_vm1, %v157_v13, 0.0  ;;  %v152_v16 = vsel %vm439_vm0, %v144_v14, 0.0 }
  0x89   : > { %v454_v17 = vadd.f32 %v170_v12, %v166_v15  ;;  %v171_v18 = vadd.f32 %v152_v16, %v426_v2  ;;  %v287_v16 = vmul.f32 1.01875, %v422_v1 }
  0x8b   : > { %v159_v19 = vpop.permute.xlu1 %158  ;;  %178 = vrot.lane.b32.xlu0 %v454_v17, %s392_s15  ;;  %v148_v20 = vpop.permute.xlu0 %147 }
  0x8c   : > { %v167_v22 = vsel %vm445_vm1, %v159_v19, 0.0  ;;  %v154_v27 = vsel %vm439_vm0, %v148_v20, 0.0 }
  0x8d   : > { %v462_v23 = vadd.f32 %v171_v18, %v167_v22  ;;  %v173_v31 = vadd.f32 %v154_v27, %v430_v3 }
  0x8f   : > { %v163_v25 = vpop.permute.xlu1 %162  ;;  %180 = vrot.lane.b32.xlu1 %v462_v23, %s392_s15  ;;  %v161_v26 = vpop.permute.xlu0 %160 }
  0x90   : > { %v168_v28 = vsel %vm445_vm1, %v161_v26, 0.0  ;;  %v169_v30 = vsel %vm445_vm1, %v163_v25, 0.0 }
  0x91   : > { %v470_v29 = vadd.f32 %v172_v24, %v168_v28  ;;  %v477_v32 = vadd.f32 %v173_v31, %v169_v30 }
  0x93   : > { %186 = vrot.lane.b32.xlu1 %v454_v17, %s393_s16  ;;  %182 = vrot.lane.b32.xlu0 %v470_v29, %s392_s15 }
  0x97   : > { %188 = vrot.lane.b32.xlu1 %v462_v23, %s393_s16  ;;  %184 = vrot.lane.b32.xlu0 %v477_v32, %s392_s15 }
  0x9b   : > { %192 = vrot.lane.b32.xlu1 %v477_v32, %s393_s16  ;;  %190 = vrot.lane.b32.xlu0 %v470_v29, %s393_s16 }
  0xfd   : > { %v179_v33 = vpop.permute.xlu0 %178 }
  0xfe   : > { %v195_v34 = vrot.slane %v179_v33, 6 }
 0x100   : > { %v196_v36 = vsel %vm194_vm2, %v195_v34, %v179_v33 }
 0x101   : > { %v203_v37 = vrot.slane %v196_v36, 6  ;;  %v181_v38 = vpop.permute.xlu1 %180 }
 0x102   : > { %v197_v39 = vrot.slane %v181_v38, 6 }
 0x103   : > { %v207_v40 = vsel %vm194_vm2, %v203_v37, %v179_v33 }
 0x104   : > { %v235_v41 = vrot.slane %v207_v40, 1  ;;  %v198_v42 = vsel %vm194_vm2, %v197_v39, %v181_v38 }
 0x105   : > { %v204_v43 = vrot.slane %v198_v42, 6  ;;  %v187_v44 = vpop.permute.xlu1 %186  ;;  %v183_v45 = vpop.permute.xlu0 %182 }
 0x106   : > { %v211_v46 = vrot.slane %v187_v44, 6  ;;  %v199_v47 = vrot.slane %v183_v45, 6  ;;  %v243_v48 = vsel %vm228_vm3, %v235_v41, 0.0 }
 0x107   : > { %v208_v49 = vsel %vm194_vm2, %v204_v43, %v181_v38  ;;  %v249_v57 = vsel %vm227_vm4, %v179_v33, %v243_v48 }
 0x108   : > { %v236_v50 = vrot.slane %v208_v49, 1  ;;  %v212_v51 = vsel %vm194_vm2, %v211_v46, %v187_v44  ;;  %v200_v52 = vsel %vm194_vm2, %v199_v47, %v183_v45  ;;  %v279_v6 = vadd.f32 %v249_v57, %v454_v17 }
 0x109   : > { %v219_v53 = vrot.slane %v212_v51, 6  ;;  %v205_v54 = vrot.slane %v200_v52, 6  ;;  %v189_v55 = vpop.permute.xlu1 %188  ;;  %v185_v56 = vpop.permute.xlu0 %184  ;;  %v290_v52 = vmul.f32 1.01875, %v430_v3 }
 0x10a   : > { %v244_v58 = vsel %vm228_vm3, %v236_v50, 0.0  ;;  %v213_v59 = vrot.slane %v189_v55, 6  ;;  %v201_v60 = vrot.slane %v185_v56, 6 }
 0x10b   : > { %v223_v61 = vsel %vm194_vm2, %v219_v53, %v187_v44  ;;  %v209_v62 = vsel %vm194_vm2, %v205_v54, %v183_v45  ;;  %v250_v7 = vsel %vm227_vm4, %v181_v38, %v244_v58 }
 0x10c   : > { %v261_v63 = vrot.slane %v223_v61, 1  ;;  %v214_v4 = vsel %vm194_vm2, %v213_v59, %v189_v55  ;;  %v202_v9 = vsel %vm194_vm2, %v201_v60, %v185_v56  ;;  %v237_v13 = vrot.slane %v209_v62, 1 }
 0x10d   : > { %v220_v8 = vrot.slane %v214_v4, 6  ;;  %v193_v10 = vpop.permute.xlu1 %192  ;;  %v191_v11 = vpop.permute.xlu0 %190  ;;  %v206_v14 = vrot.slane %v202_v9, 6  ;;  %v280_v25 = vadd.f32 %v250_v7, %v462_v23  ;;  %v288_v23 = vmul.f32 1.01875, %v426_v2 }
 0x10e   : > { %v269_v12 = vsel %vm254_vm5, %v261_v63, 0.0  ;;  %v217_v15 = vrot.slane %v193_v10, 6  ;;  %v215_v19 = vrot.slane %v191_v11, 6  ;;  %v245_v30 = vsel %vm228_vm3, %v237_v13, 0.0 }
 0x10f   : > { %v275_v17 = vsel %vm253_vm6, %v187_v44, %v269_v12  ;;  %v224_v18 = vsel %vm194_vm2, %v220_v8, %v189_v55  ;;  %v210_v22 = vsel %vm194_vm2, %v206_v14, %v185_v56  ;;  %v251_v42 = vsel %vm227_vm4, %v183_v45, %v245_v30 }
 0x110   : > { %v283_v20 = vadd.f32 %v279_v6, %v275_v17  ;;  %v262_v21 = vrot.slane %v224_v18, 1  ;;  %v218_v24 = vsel %vm194_vm2, %v217_v15, %v193_v10  ;;  %v238_v26 = vrot.slane %v210_v22, 1 }
 0x111   : > { %v222_v27 = vrot.slane %v218_v24, 6  ;;  %v216_v28 = vsel %vm194_vm2, %v215_v19, %v191_v11  ;;  %v281_v51 = vadd.f32 %v251_v42, %v470_v29 }
 0x112   : > { %v291_v1 = vmul.f32 0.01875, %v283_v20  ;;  %v270_v31 = vsel %vm254_vm5, %v262_v21, 0.0  ;;  %v221_v33 = vrot.slane %v216_v28, 6  ;;  %v246_v36 = vsel %vm228_vm3, %v238_v26, 0.0 }
 0x113   : > { %v276_v34 = vsel %vm253_vm6, %v189_v55, %v270_v31  ;;  %v226_v37 = vsel %vm194_vm2, %v222_v27, %v193_v10  ;;  %v252_v40 = vsel %vm227_vm4, %v185_v56, %v246_v36 }
 0x114   : > { %v295_v38 = vsub.f32 %v287_v16, %v291_v1  ;;  %v284_v39 = vadd.f32 %v280_v25, %v276_v34  ;;  %v264_v41 = vrot.slane %v226_v37, 1  ;;  %v225_v2 = vsel %vm194_vm2, %v221_v33, %v191_v11 }
 0x115   : > { %v282_v46 = vadd.f32 %v252_v40, %v477_v32  ;;  %v263_v47 = vrot.slane %v225_v2, 1  ;;  %v289_v32 = vmul.f32 1.01875, %v420_v0 }
 0x116   : > { %299 = vst [vmem:[%s527_s19] sm:$0x3] %v295_v38  ;;  %v292_v43 = vmul.f32 0.01875, %v284_v39  ;;  %v272_v44 = vsel %vm254_vm5, %v264_v41, 0.0 }
 0x117   : > { %v278_v48 = vsel %vm253_vm6, %v193_v10, %v272_v44  ;;  %v271_v45 = vsel %vm254_vm5, %v263_v47, 0.0 }
 0x118   : > { %v296_v49 = vsub.f32 %v288_v23, %v292_v43  ;;  %v286_v50 = vadd.f32 %v282_v46, %v278_v48  ;;  %v277_v53 = vsel %vm253_vm6, %v191_v11, %v271_v45 }
 0x119   : > { %v285_v55 = vadd.f32 %v281_v51, %v277_v53 }
 0x11a   : > { %300 = vst [vmem:[%s527_s19 + $0x2] sm:$0x3] %v296_v49  ;;  %v294_v54 = vmul.f32 0.01875, %v286_v50 }
 0x11b   : > { %v293_v56 = vmul.f32 0.01875, %v285_v55 }
 0x11c   : > { %v298_v57 = vsub.f32 %v290_v52, %v294_v54 }
 0x11d   : > { %v297_v58 = vsub.f32 %v289_v32, %v293_v56 }
 0x11e   : > { %302 = vst [vmem:[%s527_s19 + $0x6] sm:$0x3] %v298_v57 }
 0x11f   : > { %301 = vst [vmem:[%s527_s19 + $0x4] sm:$0x3] %v297_v58 }
 0x120 PF: > { %s11_s6 = sadd.s32 1, %s388_s6  }
 0x121   : > { %p8_p4 = scmp.ge.s32.totalorder %s11_s6, 4  }
 0x123   :  { %10 = sbr.rel (!%p8_p4) target bundleno = 1 (0x1), region = 54 }

</bundles_post_ra>
